<compile_context>
chip_gen: v7x
topology: tpu7x:2x2x1
jax: 0.10.0
libtpu: 0.0.40
codegen_flags: <defaults>
</compile_context>

<pallas_src>
import functools

import jax
import jax.numpy as jnp
from jax import lax
from jax.experimental import pallas as pl
from jax.experimental.pallas import tpu as pltpu

# TODO(synk): config['alpha'] is a global hyperparameter in the reference repo;
# fixed here (overridable via the `alpha` argument).
ALPHA = 0.1
EPS = 1e-8

_VMEM_TILE_BUDGET = 12 * 1024 * 1024   # double-buffered input tiles + scratch


def _round_up(a, m):
    return ((a + m - 1) // m) * m


def _pick_rows(half_rows, cap):
    """Largest multiple of 8 that divides `half_rows` (itself a multiple of 8)
    and does not exceed `cap`."""
    best = 8
    r = 8
    limit = min(cap, half_rows)
    while r <= limit:
        if half_rows % r == 0:
            best = r
        r += 8
    return best


def _greedy_hash_loss_kernel(b1_ref, b2_ref, x1_ref, x2_ref, h1_ref, h2_ref,
                             out_ref, acc1_ref, acc2_ref, *,
                             alpha, inv_pairs, inv_h, nblocks, npc):
    c = pl.program_id(0)          # TensorCore / parallel axis
    j = pl.program_id(1)          # reduction over row-pair blocks

    @pl.when(j == 0)
    def _():
        acc1_ref[...] = jnp.zeros_like(acc1_ref)
        acc2_ref[...] = jnp.zeros_like(acc2_ref)

    # Remainder block of an odd block count is clamped in the index_map and
    # must not contribute here.
    valid = (c * npc + j) < nblocks

    @pl.when(valid)
    def _():
        b1 = b1_ref[...].astype(jnp.float32)
        b2 = b2_ref[...].astype(jnp.float32)
        x1 = x1_ref[...].astype(jnp.float32)
        x2 = x2_ref[...].astype(jnp.float32)
        h1 = h1_ref[...].astype(jnp.float32)
        h2 = h2_ref[...].astype(jnp.float32)

        def cos(a, d):
            # per-row cosine similarity along the feature (lane) axis.
            dot = jnp.sum(a * d, axis=1, keepdims=True)
            na2 = jnp.sum(a * a, axis=1, keepdims=True)
            nd2 = jnp.sum(d * d, axis=1, keepdims=True)
            # dot / max(||a||*||d||, eps) == dot * rsqrt(max(||a||^2*||d||^2, eps^2))
            return dot * lax.rsqrt(jnp.maximum(na2 * nd2, EPS * EPS))

        diff = cos(b1, b2) - cos(x1, x2)                     # (rows, 1)
        acc1_ref[...] += diff * diff                          # elementwise only

        t1 = jnp.abs(h1) - 1.0
        t2 = jnp.abs(h2) - 1.0
        acc2_ref[...] += jnp.abs(t1 * t1 * t1) + jnp.abs(t2 * t2 * t2)

    @pl.when(j == pl.num_programs(1) - 1)
    def _():
        # deferred cross-lane/sublane reductions, once per core.
        l1 = jnp.sum(acc1_ref[...], keepdims=True)           # (1, 1)
        l2 = jnp.sum(acc2_ref[...], keepdims=True)           # (1, 1)
        total = l1 * inv_pairs + l2 * (alpha * inv_h)
        out_ref[...] = total.reshape(1, 1, 1).astype(out_ref.dtype)


def greedy_hash_loss(b, h, x, alpha=ALPHA, max_rows=None):
    b = jnp.asarray(b)
    h = jnp.asarray(h)
    x = jnp.asarray(x)
    n, feat = x.shape
    _, bits_b = b.shape
    _, bits_h = h.shape
    assert n % 2 == 0, "batch size must be even (top/bottom half pairing)"
    assert b.shape[0] == n and h.shape[0] == n
    half = n // 2

    # --- VMEM-budget-driven row-tile cap (inputs are double-buffered) --------
    def ib(a):
        return jnp.dtype(a.dtype).itemsize

    per_row = (2 * (2 * feat * ib(x) + 2 * bits_b * ib(b) + 2 * bits_h * ib(h))
               + 4 * (bits_h + 1))                          # f32 scratch
    cap = int(_VMEM_TILE_BUDGET // max(per_row, 1))
    cap = max(8, min(2048, (cap // 8) * 8))
    if max_rows is not None:
        cap = max(8, min(cap, (int(max_rows) // 8) * 8))

    fast = (half % 8 == 0)
    if fast:
        # Zero-copy: express the top/bottom split purely in the index_maps.
        rows = _pick_rows(half, cap)
        nblocks = half // rows
        idx_off = nblocks                 # bottom half starts nblocks blocks in
        b1 = b2 = b
        x1 = x2 = x
        h1 = h2 = h
    else:
        # Tiny / irregular batches only: pad halves with 1.0 rows
        # (cos(1s,1s)=1 on both sides and (|1|-1)^3=0 -> zero contribution).
        half_p = _round_up(half, 8)
        rows = _pick_rows(half_p, cap)
        nblocks = half_p // rows
        idx_off = 0

        def split_pad(a):
            pad = half_p - half
            top = jnp.pad(a[:half], ((0, pad), (0, 0)), constant_values=1.0)
            bot = jnp.pad(a[half:], ((0, pad), (0, 0)), constant_values=1.0)
            return top, bot

        b1, b2 = split_pad(b)
        x1, x2 = split_pad(x)
        h1, h2 = split_pad(h)

    ncores = 2 if nblocks >= 2 else 1      # v7x: split blocks across both TCs
    npc = -(-nblocks // ncores)            # blocks per core (ceil)

    def idx_top(c, j):
        g = jnp.minimum(c * npc + j, nblocks - 1)   # clamp remainder block
        return (g, 0)

    def idx_bot(c, j):
        g = jnp.minimum(c * npc + j, nblocks - 1)
        return (g + idx_off, 0)

    kernel = functools.partial(
        _greedy_hash_loss_kernel,
        alpha=float(alpha),
        inv_pairs=1.0 / float(half),
        inv_h=1.0 / float(n * bits_h),
        nblocks=nblocks,
        npc=npc,
    )

    out = pl.pallas_call(
        kernel,
        out_shape=jax.ShapeDtypeStruct((ncores, 1, 1), jnp.float32),
        grid_spec=pltpu.PrefetchScalarGridSpec(
            num_scalar_prefetch=0,
            grid=(ncores, npc),
            in_specs=[
                pl.BlockSpec((rows, bits_b), idx_top),   # b, top-half rows
                pl.BlockSpec((rows, bits_b), idx_bot),   # b, bottom-half rows
                pl.BlockSpec((rows, feat), idx_top),     # x, top-half rows
                pl.BlockSpec((rows, feat), idx_bot),     # x, bottom-half rows
                pl.BlockSpec((rows, bits_h), idx_top),   # h, top-half rows
                pl.BlockSpec((rows, bits_h), idx_bot),   # h, bottom-half rows
            ],
            out_specs=pl.BlockSpec((1, 1, 1), lambda c, j: (c, 0, 0)),
            scratch_shapes=[
                pltpu.VMEM((rows, 1), jnp.float32),      # loss1 per-row partials
                pltpu.VMEM((rows, bits_h), jnp.float32)  # loss2 elementwise partials
            ],
        ),
        compiler_params=pltpu.CompilerParams(
            dimension_semantics=("parallel", "arbitrary"),
            vmem_limit_bytes=32 * 1024 * 1024),
    )(b1, b2, x1, x2, h1, h2)

    # per-core partials are already scaled; the combine is linear.
    return jnp.sum(out)


def greedy_hash_loss_ref(b, h, x, alpha=ALPHA):
    # pure-JAX reference mirroring the PyTorch forward.
    b = b.astype(jnp.float32)
    h = h.astype(jnp.float32)
    x = x.astype(jnp.float32)
    half = x.shape[0] // 2

    def cos(a, c):
        dot = jnp.sum(a * c, axis=1)
        return dot / jnp.maximum(
            jnp.linalg.norm(a, axis=1) * jnp.linalg.norm(c, axis=1), EPS)

    tb = cos(b[:half], b[half:])
    tx = cos(x[:half], x[half:])
    loss1 = jnp.mean((tb - tx) ** 2)
    loss2 = alpha * jnp.mean(jnp.abs((jnp.abs(h) - 1.0) ** 3))
    return loss1 + loss2


if __name__ == "__main__":
    key = jax.random.PRNGKey(0)
    k1, k2, k3, k4 = jax.random.split(key, 4)

    # --- Test 1: tiny batch, odd half -> padded fallback path ----------------
    N, BITS, FEAT = 8, 32, 64
    h = jax.random.normal(k1, (N, BITS), dtype=jnp.float32)
    b = jnp.sign(h)                      # binary hash codes, as in GreedyHash
    x = jax.random.normal(k2, (N, FEAT), dtype=jnp.float32)
    got = jax.block_until_ready(greedy_hash_loss(b, h, x))
    want = greedy_hash_loss_ref(b, h, x)
    assert jnp.allclose(got, want, rtol=1e-4, atol=1e-5), (got, want)

    # --- Test 2: zero-copy fast path, even block count, 2-core split ---------
    N2, BITS2, FEAT2 = 64, 16, 256
    h2 = jax.random.normal(k3, (N2, BITS2), dtype=jnp.float32)
    b2 = jnp.sign(h2)
    x2 = jax.random.normal(k4, (N2, FEAT2), dtype=jnp.float32)
    got2 = jax.block_until_ready(greedy_hash_loss(b2, h2, x2, max_rows=8))
    want2 = greedy_hash_loss_ref(b2, h2, x2)
    assert jnp.allclose(got2, want2, rtol=1e-4, atol=1e-5), (got2, want2)

    # --- Test 3: odd block count -> exercises clamped/masked remainder block -
    N3, BITS3, FEAT3 = 48, 32, 128
    h3 = jax.random.normal(k1, (N3, BITS3), dtype=jnp.float32)
    b3 = jnp.sign(h3)
    x3 = jax.random.normal(k2, (N3, FEAT3), dtype=jnp.float32)
    got3 = jax.block_until_ready(greedy_hash_loss(b3, h3, x3, max_rows=8))
    want3 = greedy_hash_loss_ref(b3, h3, x3)
    assert jnp.allclose(got3, want3, rtol=1e-4, atol=1e-5), (got3, want3)

    print("KERNEL_OK")
</pallas_src>

<mosaic_0001>
module attributes {stable_mosaic.version = 11 : i64} {
  func.func @_greedy_hash_loss_kernel(%arg0: i32, %arg1: i32, %arg2: memref<8x32xf32, #tpu.memory_space<vmem>>, %arg3: memref<8x32xf32, #tpu.memory_space<vmem>>, %arg4: memref<8x64xf32, #tpu.memory_space<vmem>>, %arg5: memref<8x64xf32, #tpu.memory_space<vmem>>, %arg6: memref<8x32xf32, #tpu.memory_space<vmem>>, %arg7: memref<8x32xf32, #tpu.memory_space<vmem>>, %arg8: memref<1x1x1xf32, #tpu.memory_space<vmem>>, %arg9: memref<8x1xf32, #tpu.memory_space<vmem>>, %arg10: memref<8x32xf32, #tpu.memory_space<vmem>>) attributes {dimension_semantics = [#tpu.dimension_semantics<parallel>, #tpu.dimension_semantics<arbitrary>], iteration_bounds = array<i64: 1, 1>, scalar_prefetch = 0 : i64, scratch_operands = 2 : i64, tpu.core_type = #tpu.core_type<tc>, window_params = [{transform_indices = @transform_0, window_bounds = array<i64: 8, 32>}, {transform_indices = @transform_1, window_bounds = array<i64: 8, 32>}, {transform_indices = @transform_2, window_bounds = array<i64: 8, 64>}, {transform_indices = @transform_3, window_bounds = array<i64: 8, 64>}, {transform_indices = @transform_4, window_bounds = array<i64: 8, 32>}, {transform_indices = @transform_5, window_bounds = array<i64: 8, 32>}, {transform_indices = @transform_6, window_bounds = array<i64: 1, 1, 1>}]} {
    %c0_i32 = arith.constant 0 : i32
    %0 = arith.cmpi eq, %arg1, %c0_i32 : i32
    %1 = arith.extui %0 : i1 to i32
    %c0_i32_0 = arith.constant 0 : i32
    %2 = arith.cmpi ne, %1, %c0_i32_0 : i32
    scf.if %2 {
      %cst = arith.constant 0.000000e+00 : f32
      %11 = vector.broadcast %cst : f32 to vector<8x1xf32>
      %c0 = arith.constant 0 : index
      %c0_5 = arith.constant 0 : index
      %12 = vector.load %arg9[%c0, %c0_5] : memref<8x1xf32, #tpu.memory_space<vmem>>, vector<8x1xf32>
      tpu.vector_store %arg9[%c0, %c0_5], %11 {strides = array<i32>} : memref<8x1xf32, #tpu.memory_space<vmem>>, vector<8x1xf32>,
      %cst_6 = arith.constant 0.000000e+00 : f32
      %13 = vector.broadcast %cst_6 : f32 to vector<8x32xf32>
      %c0_7 = arith.constant 0 : index
      %c0_8 = arith.constant 0 : index
      %14 = vector.load %arg10[%c0_7, %c0_8] : memref<8x32xf32, #tpu.memory_space<vmem>>, vector<8x32xf32>
      tpu.vector_store %arg10[%c0_7, %c0_8], %13 {strides = array<i32>} : memref<8x32xf32, #tpu.memory_space<vmem>>, vector<8x32xf32>,
    } else {
    }
    %c1_i32 = arith.constant 1 : i32
    %3 = arith.muli %arg0, %c1_i32 : i32
    %4 = arith.addi %3, %arg1 : i32
    %c1_i32_1 = arith.constant 1 : i32
    %5 = arith.cmpi slt, %4, %c1_i32_1 : i32
    %6 = arith.extui %5 : i1 to i32
    %c0_i32_2 = arith.constant 0 : i32
    %7 = arith.cmpi ne, %6, %c0_i32_2 : i32
    scf.if %7 {
      %c0 = arith.constant 0 : index
      %c0_5 = arith.constant 0 : index
      %11 = vector.load %arg2[%c0, %c0_5] : memref<8x32xf32, #tpu.memory_space<vmem>>, vector<8x32xf32>
      %c0_6 = arith.constant 0 : index
      %c0_7 = arith.constant 0 : index
      %12 = vector.load %arg3[%c0_6, %c0_7] : memref<8x32xf32, #tpu.memory_space<vmem>>, vector<8x32xf32>
      %c0_8 = arith.constant 0 : index
      %c0_9 = arith.constant 0 : index
      %13 = vector.load %arg4[%c0_8, %c0_9] : memref<8x64xf32, #tpu.memory_space<vmem>>, vector<8x64xf32>
      %c0_10 = arith.constant 0 : index
      %c0_11 = arith.constant 0 : index
      %14 = vector.load %arg5[%c0_10, %c0_11] : memref<8x64xf32, #tpu.memory_space<vmem>>, vector<8x64xf32>
      %c0_12 = arith.constant 0 : index
      %c0_13 = arith.constant 0 : index
      %15 = vector.load %arg6[%c0_12, %c0_13] : memref<8x32xf32, #tpu.memory_space<vmem>>, vector<8x32xf32>
      %c0_14 = arith.constant 0 : index
      %c0_15 = arith.constant 0 : index
      %16 = vector.load %arg7[%c0_14, %c0_15] : memref<8x32xf32, #tpu.memory_space<vmem>>, vector<8x32xf32>
      %17 = arith.mulf %11, %12 : vector<8x32xf32>
      %cst = arith.constant dense<0.000000e+00> : vector<8xf32>
      %18 = vector.multi_reduction <add>, %17, %cst [1] : vector<8x32xf32> to vector<8xf32>
      %19 = vector.shape_cast %18 : vector<8xf32> to vector<8x1xf32>
      %20 = arith.mulf %11, %11 : vector<8x32xf32>
      %cst_16 = arith.constant dense<0.000000e+00> : vector<8xf32>
      %21 = vector.multi_reduction <add>, %20, %cst_16 [1] : vector<8x32xf32> to vector<8xf32>
      %22 = vector.shape_cast %21 : vector<8xf32> to vector<8x1xf32>
      %23 = arith.mulf %12, %12 : vector<8x32xf32>
      %cst_17 = arith.constant dense<0.000000e+00> : vector<8xf32>
      %24 = vector.multi_reduction <add>, %23, %cst_17 [1] : vector<8x32xf32> to vector<8xf32>
      %25 = vector.shape_cast %24 : vector<8xf32> to vector<8x1xf32>
      %26 = arith.mulf %22, %25 : vector<8x1xf32>
      %cst_18 = arith.constant 1.000000e-16 : f32
      %27 = vector.broadcast %cst_18 : f32 to vector<8x1xf32>
      %28 = arith.maximumf %26, %27 : vector<8x1xf32>
      %29 = math.rsqrt %28 : vector<8x1xf32>
      %30 = arith.mulf %19, %29 : vector<8x1xf32>
      %31 = arith.mulf %13, %14 : vector<8x64xf32>
      %cst_19 = arith.constant dense<0.000000e+00> : vector<8xf32>
      %32 = vector.multi_reduction <add>, %31, %cst_19 [1] : vector<8x64xf32> to vector<8xf32>
      %33 = vector.shape_cast %32 : vector<8xf32> to vector<8x1xf32>
      %34 = arith.mulf %13, %13 : vector<8x64xf32>
      %cst_20 = arith.constant dense<0.000000e+00> : vector<8xf32>
      %35 = vector.multi_reduction <add>, %34, %cst_20 [1] : vector<8x64xf32> to vector<8xf32>
      %36 = vector.shape_cast %35 : vector<8xf32> to vector<8x1xf32>
      %37 = arith.mulf %14, %14 : vector<8x64xf32>
      %cst_21 = arith.constant dense<0.000000e+00> : vector<8xf32>
      %38 = vector.multi_reduction <add>, %37, %cst_21 [1] : vector<8x64xf32> to vector<8xf32>
      %39 = vector.shape_cast %38 : vector<8xf32> to vector<8x1xf32>
      %40 = arith.mulf %36, %39 : vector<8x1xf32>
      %cst_22 = arith.constant 1.000000e-16 : f32
      %41 = vector.broadcast %cst_22 : f32 to vector<8x1xf32>
      %42 = arith.maximumf %40, %41 : vector<8x1xf32>
      %43 = math.rsqrt %42 : vector<8x1xf32>
      %44 = arith.mulf %33, %43 : vector<8x1xf32>
      %45 = arith.subf %30, %44 : vector<8x1xf32>
      %c0_23 = arith.constant 0 : index
      %c0_24 = arith.constant 0 : index
      %46 = vector.load %arg9[%c0_23, %c0_24] : memref<8x1xf32, #tpu.memory_space<vmem>>, vector<8x1xf32>
      %47 = arith.mulf %45, %45 : vector<8x1xf32>
      %48 = arith.addf %46, %47 : vector<8x1xf32>
      %c0_25 = arith.constant 0 : index
      %c0_26 = arith.constant 0 : index
      %49 = vector.load %arg9[%c0_25, %c0_26] : memref<8x1xf32, #tpu.memory_space<vmem>>, vector<8x1xf32>
      tpu.vector_store %arg9[%c0_25, %c0_26], %48 {strides = array<i32>} : memref<8x1xf32, #tpu.memory_space<vmem>>, vector<8x1xf32>,
      %50 = math.absf %15 : vector<8x32xf32>
      %cst_27 = arith.constant 1.000000e+00 : f32
      %51 = vector.broadcast %cst_27 : f32 to vector<8x32xf32>
      %52 = arith.subf %50, %51 : vector<8x32xf32>
      %53 = math.absf %16 : vector<8x32xf32>
      %cst_28 = arith.constant 1.000000e+00 : f32
      %54 = vector.broadcast %cst_28 : f32 to vector<8x32xf32>
      %55 = arith.subf %53, %54 : vector<8x32xf32>
      %c0_29 = arith.constant 0 : index
      %c0_30 = arith.constant 0 : index
      %56 = vector.load %arg10[%c0_29, %c0_30] : memref<8x32xf32, #tpu.memory_space<vmem>>, vector<8x32xf32>
      %57 = arith.mulf %52, %52 : vector<8x32xf32>
      %58 = arith.mulf %57, %52 : vector<8x32xf32>
      %59 = math.absf %58 : vector<8x32xf32>
      %60 = arith.mulf %55, %55 : vector<8x32xf32>
      %61 = arith.mulf %60, %55 : vector<8x32xf32>
      %62 = math.absf %61 : vector<8x32xf32>
      %63 = arith.addf %59, %62 : vector<8x32xf32>
      %64 = arith.addf %56, %63 : vector<8x32xf32>
      %c0_31 = arith.constant 0 : index
      %c0_32 = arith.constant 0 : index
      %65 = vector.load %arg10[%c0_31, %c0_32] : memref<8x32xf32, #tpu.memory_space<vmem>>, vector<8x32xf32>
      tpu.vector_store %arg10[%c0_31, %c0_32], %64 {strides = array<i32>} : memref<8x32xf32, #tpu.memory_space<vmem>>, vector<8x32xf32>,
    } else {
    }
    %c0_i32_3 = arith.constant 0 : i32
    %8 = arith.cmpi eq, %arg1, %c0_i32_3 : i32
    %9 = arith.extui %8 : i1 to i32
    %c0_i32_4 = arith.constant 0 : i32
    %10 = arith.cmpi ne, %9, %c0_i32_4 : i32
    scf.if %10 {
      %c0 = arith.constant 0 : index
      %c0_5 = arith.constant 0 : index
      %11 = vector.load %arg9[%c0, %c0_5] : memref<8x1xf32, #tpu.memory_space<vmem>>, vector<8x1xf32>
      %12 = vector.shape_cast %11 : vector<8x1xf32> to vector<1x8x1xf32>
      %cst = arith.constant dense<0.000000e+00> : vector<1xf32>
      %13 = vector.multi_reduction <add>, %12, %cst [1, 2] : vector<1x8x1xf32> to vector<1xf32>
      %14 = vector.shape_cast %13 : vector<1xf32> to vector<1x1x1xf32>
      %15 = vector.extract %14[0, 0, 0] : f32 from vector<1x1x1xf32>
      %16 = vector.broadcast %15 : f32 to vector<1x1xf32>
      %c0_6 = arith.constant 0 : index
      %c0_7 = arith.constant 0 : index
      %17 = vector.load %arg10[%c0_6, %c0_7] : memref<8x32xf32, #tpu.memory_space<vmem>>, vector<8x32xf32>
      %18 = vector.shape_cast %17 : vector<8x32xf32> to vector<1x8x32xf32>
      %cst_8 = arith.constant dense<0.000000e+00> : vector<1xf32>
      %19 = vector.multi_reduction <add>, %18, %cst_8 [1, 2] : vector<1x8x32xf32> to vector<1xf32>
      %20 = vector.shape_cast %19 : vector<1xf32> to vector<1x1x1xf32>
      %21 = vector.extract %20[0, 0, 0] : f32 from vector<1x1x1xf32>
      %22 = vector.broadcast %21 : f32 to vector<1x1xf32>
      %cst_9 = arith.constant 2.500000e-01 : f32
      %23 = vector.broadcast %cst_9 : f32 to vector<1x1xf32>
      %24 = arith.mulf %16, %23 : vector<1x1xf32>
      %cst_10 = arith.constant 3.906250e-04 : f32
      %25 = vector.broadcast %cst_10 : f32 to vector<1x1xf32>
      %26 = arith.mulf %22, %25 : vector<1x1xf32>
      %27 = arith.addf %24, %26 : vector<1x1xf32>
      %28 = vector.shape_cast %27 : vector<1x1xf32> to vector<1x1x1xf32>
      %c0_11 = arith.constant 0 : index
      %c0_12 = arith.constant 0 : index
      %c0_13 = arith.constant 0 : index
      %29 = vector.load %arg8[%c0_11, %c0_12, %c0_13] : memref<1x1x1xf32, #tpu.memory_space<vmem>>, vector<1x1x1xf32>
      tpu.vector_store %arg8[%c0_11, %c0_12, %c0_13], %28 {strides = array<i32>} : memref<1x1x1xf32, #tpu.memory_space<vmem>>, vector<1x1x1xf32>,
    } else {
    }
    return
  }
  func.func @transform_0(%arg0: i32, %arg1: i32) -> (i32, i32) {
    %c1_i32 = arith.constant 1 : i32
    %0 = arith.muli %arg0, %c1_i32 : i32
    %1 = arith.addi %0, %arg1 : i32
    %c0_i32 = arith.constant 0 : i32
    %2 = arith.minsi %1, %c0_i32 : i32
    %c0_i32_0 = arith.constant 0 : i32
    %c0_i32_1 = arith.constant 0 : i32
    return %2, %c0_i32_0 : i32, i32
  }
  func.func @transform_1(%arg0: i32, %arg1: i32) -> (i32, i32) {
    %c1_i32 = arith.constant 1 : i32
    %0 = arith.muli %arg0, %c1_i32 : i32
    %1 = arith.addi %0, %arg1 : i32
    %c0_i32 = arith.constant 0 : i32
    %2 = arith.minsi %1, %c0_i32 : i32
    %c0_i32_0 = arith.constant 0 : i32
    %3 = arith.addi %2, %c0_i32_0 : i32
    %c0_i32_1 = arith.constant 0 : i32
    %c0_i32_2 = arith.constant 0 : i32
    return %3, %c0_i32_1 : i32, i32
  }
  func.func @transform_2(%arg0: i32, %arg1: i32) -> (i32, i32) {
    %c1_i32 = arith.constant 1 : i32
    %0 = arith.muli %arg0, %c1_i32 : i32
    %1 = arith.addi %0, %arg1 : i32
    %c0_i32 = arith.constant 0 : i32
    %2 = arith.minsi %1, %c0_i32 : i32
    %c0_i32_0 = arith.constant 0 : i32
    %c0_i32_1 = arith.constant 0 : i32
    return %2, %c0_i32_0 : i32, i32
  }
  func.func @transform_3(%arg0: i32, %arg1: i32) -> (i32, i32) {
    %c1_i32 = arith.constant 1 : i32
    %0 = arith.muli %arg0, %c1_i32 : i32
    %1 = arith.addi %0, %arg1 : i32
    %c0_i32 = arith.constant 0 : i32
    %2 = arith.minsi %1, %c0_i32 : i32
    %c0_i32_0 = arith.constant 0 : i32
    %3 = arith.addi %2, %c0_i32_0 : i32
    %c0_i32_1 = arith.constant 0 : i32
    %c0_i32_2 = arith.constant 0 : i32
    return %3, %c0_i32_1 : i32, i32
  }
  func.func @transform_4(%arg0: i32, %arg1: i32) -> (i32, i32) {
    %c1_i32 = arith.constant 1 : i32
    %0 = arith.muli %arg0, %c1_i32 : i32
    %1 = arith.addi %0, %arg1 : i32
    %c0_i32 = arith.constant 0 : i32
    %2 = arith.minsi %1, %c0_i32 : i32
    %c0_i32_0 = arith.constant 0 : i32
    %c0_i32_1 = arith.constant 0 : i32
    return %2, %c0_i32_0 : i32, i32
  }
  func.func @transform_5(%arg0: i32, %arg1: i32) -> (i32, i32) {
    %c1_i32 = arith.constant 1 : i32
    %0 = arith.muli %arg0, %c1_i32 : i32
    %1 = arith.addi %0, %arg1 : i32
    %c0_i32 = arith.constant 0 : i32
    %2 = arith.minsi %1, %c0_i32 : i32
    %c0_i32_0 = arith.constant 0 : i32
    %3 = arith.addi %2, %c0_i32_0 : i32
    %c0_i32_1 = arith.constant 0 : i32
    %c0_i32_2 = arith.constant 0 : i32
    return %3, %c0_i32_1 : i32, i32
  }
  func.func @transform_6(%arg0: i32, %arg1: i32) -> (i32, i32, i32) {
    %c0_i32 = arith.constant 0 : i32
    %c0_i32_0 = arith.constant 0 : i32
    %c0_i32_1 = arith.constant 0 : i32
    return %arg0, %c0_i32, %c0_i32_0 : i32, i32, i32
  }
}

</mosaic_0001>

<bundles_post_ra>
// kernel: tpu_custom_call.1
= control target key start
LH: loop header
LB: loop body
LE: loop exit
PB: predicated region body
PF: predicated region fallthrough
CT: control target
= control target key end

     0   :  { %11 = vsyncpa [#allocation5], 0  ;;  %s554_s0 = inlined_call_operand.hbm [shape: f32[8,32], index: 0, kind: input, shape index: {}]   ;;  %s555_s1 = inlined_call_operand.hbm [shape: f32[8,32], index: 1, kind: input, shape index: {}]   ;;  %s556_s2 = inlined_call_operand.hbm [shape: f32[8,64], index: 2, kind: input, shape index: {}]   ;;  %s557_s3 = inlined_call_operand.vmem [shape: f32[8,64], index: 3, kind: input, shape index: {}]   ;;  %s558_s4 = inlined_call_operand.hbm [shape: f32[8,32], index: 4, kind: input, shape index: {}]   ;;  %s559_s5 = inlined_call_operand.vmem [shape: f32[8,32], index: 5, kind: input, shape index: {}]   ;;  %s560_s6 = inlined_call_operand.hbm [shape: f32[1,1,1], index: 6, kind: output, shape index: {}]  }
   0x1   :  { %12 = vsyncpa [#allocation8], 0 }
   0x2   :  { %13 = vsyncpa [#allocation11], 0 }
   0x3   :  { %14 = vsyncpa [#allocation6], 0  ;;  %s435_s21 = smov [#allocation7]   ;;  %s436_s23 = smov [#allocation4]  }
   0x4   :  { %s41_s22 = sshll.u32 %s435_s21, 4  ;;  %s26_s24 = sshll.u32 %s436_s23, 4  ;;  %s42_s22 = int_to_ptr.vmem [resolvable:$true] %s41_s22  ;;  %s27_s24 = int_to_ptr.vmem [resolvable:$true] %s26_s24 }
   0x5   :  { %s317_s27 = scalar_lea.hbm %s555_s1, 128 }
   0x6   :  { %p318_p0 = scmp.ne.s32.totalorder %s555_s1, %s317_s27  ;;  %p321_p1 = scmp.lt.u32.totalorder %s317_s27, %s555_s1 }
   0x8   :  { %p323_p2 = pnand %p321_p1, %p318_p0 }
   0xa   :  { %326 = shalt.err (!%p323_p2)
}
   0xb   :  { %s327_s8 = scalar_lea.vmem %s42_s22, 128  ;;  %p332_p4 = scmp.lt.s32.totalorder %s42_s22, %s42_s22 }
   0xc   :  { %p328_p3 = scmp.ne.s32.totalorder %s42_s22, %s327_s8  ;;  %p333_p5 = scmp.lt.s32.totalorder %s327_s8, %s327_s8 }
   0xe   :  { %p334_p6 = por %p333_p5, %p332_p4 }
  0x10   :  { %p335_p7 = pnand %p334_p6, %p328_p3 }
  0x12   :  { %338 = shalt.err (!%p335_p7)
}
  0x13   :  { %44 = dma.hbm_to_vmem [thread:$0]  %s555_s1, 128, %s42_s22, [#allocation8]  }
  0x14   :  { %s339_s13 = scalar_lea.hbm %s554_s0, 128 }
  0x15   :  { %p340_p8 = scmp.ne.s32.totalorder %s554_s0, %s339_s13  ;;  %p343_p9 = scmp.lt.u32.totalorder %s339_s13, %s554_s0 }
  0x17   :  { %p345_p10 = pnand %p343_p9, %p340_p8 }
  0x19   :  { %348 = shalt.err (!%p345_p10)
}
  0x1a   :  { %s349_s18 = scalar_lea.vmem %s27_s24, 128  ;;  %p354_p12 = scmp.lt.s32.totalorder %s27_s24, %s27_s24 }
  0x1b   :  { %p350_p11 = scmp.ne.s32.totalorder %s27_s24, %s349_s18  ;;  %p355_p13 = scmp.lt.s32.totalorder %s349_s18, %s349_s18 }
  0x1d   :  { %p356_p0 = por %p355_p13, %p354_p12 }
  0x1f   :  { %p357_p1 = pnand %p356_p0, %p350_p11 }
  0x21   :  { %360 = shalt.err (!%p357_p1)
}
  0x22   :  { %29 = dma.hbm_to_vmem [thread:$0]  %s554_s0, 128, %s27_s24, [#allocation5]  }
  0x23   :  { %s437_s20 = smov [#allocation9]   ;;  %s438_s22 = smov [#allocation10]  }
  0x24   :  { %s56_s21 = sshll.u32 %s437_s20, 4  ;;  %s83_s23 = sshll.u32 %s438_s22, 4  ;;  %s57_s21 = int_to_ptr.vmem [resolvable:$true] %s56_s21  ;;  %s84_s23 = int_to_ptr.vmem [resolvable:$true] %s83_s23 }
  0x25   :  { %s361_s27 = scalar_lea.hbm %s556_s2, 128 }
  0x26   :  { %p362_p2 = scmp.ne.s32.totalorder %s556_s2, %s361_s27  ;;  %p365_p3 = scmp.lt.u32.totalorder %s361_s27, %s556_s2 }
  0x28   :  { %p367_p4 = pnand %p365_p3, %p362_p2 }
  0x2a   :  { %370 = shalt.err (!%p367_p4)
}
  0x2b   :  { %s371_s0 = scalar_lea.vmem %s57_s21, 128  ;;  %p376_p6 = scmp.lt.s32.totalorder %s57_s21, %s57_s21 }
  0x2c   :  { %p372_p5 = scmp.ne.s32.totalorder %s57_s21, %s371_s0  ;;  %p377_p7 = scmp.lt.s32.totalorder %s371_s0, %s371_s0 }
  0x2e   :  { %p378_p8 = por %p377_p7, %p376_p6 }
  0x30   :  { %p379_p9 = pnand %p378_p8, %p372_p5 }
  0x32   :  { %382 = shalt.err (!%p379_p9)
}
  0x33   :  { %59 = dma.hbm_to_vmem [thread:$0]  %s556_s2, 128, %s57_s21, [#allocation8]  }
  0x34   :  { %s383_s11 = scalar_lea.hbm %s558_s4, 128 }
  0x35   :  { %p384_p10 = scmp.ne.s32.totalorder %s558_s4, %s383_s11  ;;  %p387_p11 = scmp.lt.u32.totalorder %s383_s11, %s558_s4 }
  0x37   :  { %p389_p12 = pnand %p387_p11, %p384_p10 }
  0x39   :  { %392 = shalt.err (!%p389_p12)
}
  0x3a   :  { %s393_s16 = scalar_lea.vmem %s84_s23, 128  ;;  %p398_p0 = scmp.lt.s32.totalorder %s84_s23, %s84_s23 }
  0x3b   :  { %p394_p13 = scmp.ne.s32.totalorder %s84_s23, %s393_s16  ;;  %p399_p1 = scmp.lt.s32.totalorder %s393_s16, %s393_s16 }
  0x3d   :  { %p400_p2 = por %p399_p1, %p398_p0 }
  0x3f   :  { %p401_p3 = pnand %p400_p2, %p394_p13 }
  0x41   :  { %404 = shalt.err (!%p401_p3)
}
  0x42   :  { %86 = dma.hbm_to_vmem [thread:$0]  %s558_s4, 128, %s84_s23, [#allocation11]  }
  0x43   :  { %427 = dma.done.wait [#allocation5], 128  }
  0x44   :  { %428 = vsyncadd [#allocation5], 4294967168 }
  0x45   :  { %429 = dma.done.wait [#allocation8], 256  }
  0x46   :  { %430 = vsyncadd [#allocation8], 4294967040 }
  0x47   :  { %431 = dma.done.wait [#allocation11], 128  }
  0x48   :  { %432 = vsyncadd [#allocation11], 4294967168  ;;  %vm163_vm0 = vcmask 261120   ;;  %v439_v0 = vmov 0.0   ;;  %v172_v1 = vld [vmem:[#allocation9] sm:$0xff]  ;;  %vm194_vm1 = vcmask 523264  }
  0x49   :  { %164 = vst.msk [vmem:[#allocation3] sm:$0xff] %vm163_vm0, %v439_v0  ;;  %v170_v2 = vld [vmem:[#allocation4] sm:$0xff]  ;;  %v174_v3 = vld [vmem:[#allocation10] sm:$0xff]  ;;  %v198_v4 = vmul.f32 %v172_v1, %v172_v1  ;;  %v175_v5 = vld [vmem:[%s559_s5] sm:$0xff]  ;;  %vm161_vm2 = vcmask 7168   ;;  %s440_s20 = smov [#allocation12]  }
  0x4a   :  { %v181_v6 = vmul.f32 %v170_v2, %v170_v2  ;;  %v216_v7 = vand.u32 2147483647, %v174_v3  ;;  %v173_v8 = vld [vmem:[%s557_s3] sm:$0xff]  ;;  %v218_v9 = vand.u32 2147483647, %v175_v5  ;;  %v171_v11 = vld [vmem:[#allocation7] sm:$0xff] }
  0x4b   :  { %v202_v10 = vmul.f32 %v173_v8, %v173_v8  ;;  %v199_v12 = vsel %vm194_vm1, %v198_v4, 0.0  ;;  %v185_v15 = vmul.f32 %v171_v11, %v171_v11  ;;  %v193_v17 = vmul.f32 %v173_v8, %v172_v1  ;;  %162 = vst.msk [vmem:[#allocation2] sm:$0xff] %vm161_vm2, %v439_v0  ;;  %s270_s21 = sshll.u32 %s440_s20, 4  ;;  %s271_s21 = int_to_ptr.vmem [resolvable:$true] %s270_s21 }
  0x4c   :  { %v182_v13 = vsel %vm163_vm0, %v181_v6, 0.0  ;;  %v301_v14 = vadd.f32 -1.0, %v216_v7  ;;  %200 = vadd.xlane.f32.xlu1 %v199_v12  ;;  %v302_v16 = vadd.f32 -1.0, %v218_v9  ;;  %v176_v21 = vmul.f32 %v171_v11, %v170_v2  ;;  %s405_s22 = scalar_lea.vmem %s271_s21, 16  ;;  %s409_s23 = scalar_lea.vmem %s271_s21, 32 }
  0x4d   :  { %183 = vadd.xlane.f32.xlu0 %v182_v13  ;;  %v203_v19 = vsel %vm194_vm1, %v202_v10, 0.0  ;;  %v186_v20 = vsel %vm163_vm0, %v185_v15, 0.0  ;;  %v195_v26 = vsel %vm194_vm1, %v193_v17, 0.0  ;;  %vm262_vm3 = vcmask 0   ;;  %p406_p4 = scmp.ne.s32.totalorder %s271_s21, %s405_s22  ;;  %p410_p5 = scmp.lt.s32.totalorder %s271_s21, %s271_s21 }
  0x4e   :  { %v221_v18 = vmul.f32 %v301_v14, %v301_v14  ;;  %v224_v22 = vmul.f32 %v302_v16, %v302_v16  ;;  %v178_v27 = vsel %vm163_vm0, %v176_v21, 0.0  ;;  %p411_p6 = scmp.lt.s32.totalorder %s409_s23, %s405_s22 }
  0x50   :  { %v222_v23 = vmul.f32 %v301_v14, %v221_v18  ;;  %v225_v24 = vmul.f32 %v302_v16, %v224_v22  ;;  %204 = vadd.xlane.f32.xlu1 %v203_v19  ;;  %v220_v29 = vld [vmem:[#allocation3] sm:$0xff]  ;;  %p412_p7 = por %p411_p6, %p410_p5 }
  0x51   :  { %187 = vadd.xlane.f32.xlu0 %v186_v20 }
  0x52   :  { %v223_v25 = vand.u32 2147483647, %v222_v23  ;;  %v226_v28 = vand.u32 2147483647, %v225_v24  ;;  %v211_v49 = vld [vmem:[#allocation2] sm:$0xff]  ;;  %p413_p8 = pnand %p412_p7, %p406_p4 }
  0x54   :  { %v227_v30 = vadd.f32 %v226_v28, %v223_v25  ;;  %196 = vadd.xlane.f32.xlu1 %v195_v26 }
  0x55   :  { %179 = vadd.xlane.f32.xlu0 %v178_v27 }
  0x56   :  { %v228_v31 = vadd.f32 %v227_v30, %v220_v29 }
  0x58   :  { %229 = vst.msk [vmem:[#allocation3] sm:$0xff] %vm163_vm0, %v228_v31 }
  0x5f   :  { %v246_v32 = vld [vmem:[#allocation3] sm:$0xff] }
  0x60   :  { %v248_v33 = vsel %vm163_vm0, %v246_v32, 0.0 }
  0x61   :  { %249 = vadd.xlane.f32.xlu1 %v248_v33 }
  0xd9   :  { %v201_v34 = vpop.xlane.xlu1 %200 }
  0xda   :  { %v184_v35 = vpop.xlane.xlu0 %183 }
  0xdd   :  { %v205_v36 = vpop.xlane.xlu1 %204 }
  0xde   :  { %v188_v37 = vpop.xlane.xlu0 %187  ;;  %v206_v38 = vmul.f32 %v205_v36, %v201_v34 }
  0xdf   :  { %v189_v39 = vmul.f32 %v188_v37, %v184_v35 }
  0xe0   :  { %v207_v40 = vmax.f32 %v206_v38, 1e-16 }
  0xe1   :  { %v190_v41 = vmax.f32 %v189_v39, 1e-16  ;;  %v197_v42 = vpop.xlane.xlu1 %196 }
  0xe2   :  { %313 = vrsqrt.f32 %v207_v40  ;;  %v180_v43 = vpop.xlane.xlu0 %179 }
  0xe3   :  { %315 = vrsqrt.f32 %v190_v41 }
  0xec   :  { %v314_v44 = vpop.eup %313 }
  0xed   :  { %v316_v45 = vpop.eup %315  ;;  %v209_v46 = vmul.f32 %v314_v44, %v197_v42 }
  0xee   :  { %v192_v47 = vmul.f32 %v316_v45, %v180_v43  ;;  %v250_v54 = vpop.xlane.xlu1 %249 }
  0xef   :  { %v251_v55 = vrot.slane %v250_v54, 4 }
  0xf0   :  { %v210_v48 = vsub.f32 %v192_v47, %v209_v46 }
  0xf1   :  { %v252_v56 = vadd.f32 %v251_v55, %v250_v54 }
  0xf2   :  { %v212_v50 = vmul.f32 %v210_v48, %v210_v48 }
  0xf3   :  { %v253_v57 = vrot.slane %v252_v56, 2 }
  0xf4   :  { %v213_v51 = vadd.f32 %v212_v50, %v211_v49 }
  0xf5   :  { %v254_v61 = vadd.f32 %v253_v57, %v252_v56 }
  0xf6   :  { %215 = vst.msk [vmem:[#allocation2] sm:$0xff] %vm161_vm2, %v213_v51 }
  0xf7   :  { %v255_v0 = vrot.slane %v254_v61, 1 }
  0xf9   :  { %v256_v3 = vadd.f32 %v255_v0, %v254_v61 }
  0xfd   :  { %v233_v52 = vld [vmem:[#allocation2] sm:$0xff] }
  0xfe   :  { %v235_v53 = vsel %vm161_vm2, %v233_v52, 0.0 }
  0xff   :  { %236 = vadd.xlane.f32.xlu0 %v235_v53 }
 0x18c   :  { %v237_v58 = vpop.xlane.xlu0 %236 }
 0x18d   :  { %v238_v59 = vrot.slane %v237_v58, 4 }
 0x18f   :  { %v239_v60 = vadd.f32 %v238_v59, %v237_v58 }
 0x191   :  { %v240_v62 = vrot.slane %v239_v60, 2 }
 0x193   :  { %v241_v63 = vadd.f32 %v240_v62, %v239_v60 }
 0x195   :  { %v242_v1 = vrot.slane %v241_v63, 1 }
 0x197   :  { %v243_v2 = vadd.f32 %v242_v1, %v241_v63 }
 0x199   :  { %303 = vpush %v243_v2 }
 0x19a   :  { %305 = vpush %v256_v3 }
 0x1ca   :  { %s304_s3 = spop %303 }
 0x1cb   :  { %v245_v4 = vstv %s304_s3  ;;  %s306_s5 = spop %305 }
 0x1cc   :  { %v259_v5 = vmul.f32 0.25, %v245_v4  ;;  %v258_v6 = vstv %s306_s5 }
 0x1cd   :  { %v260_v7 = vmul.f32 0.000390625, %v258_v6 }
 0x1cf   :  { %v261_v8 = vadd.f32 %v260_v7, %v259_v5 }
 0x1d1   :  { %263 = vst.msk [vmem:[#allocation12] sm:$0x1] %vm262_vm3, %v261_v8 }
 0x1d2   :  { %416 = shalt.err (!%p413_p8)
}
 0x1d3   :  { %s417_s27 = scalar_lea.hbm %s560_s6, 16 }
 0x1d4   :  { %p418_p9 = scmp.ne.s32.totalorder %s560_s6, %s417_s27  ;;  %p421_p10 = scmp.lt.u32.totalorder %s417_s27, %s560_s6 }
 0x1d6   :  { %p423_p11 = pnand %p421_p10, %p418_p9 }
 0x1d8   :  { %426 = shalt.err (!%p423_p11)
}
 0x1d9   :  { %273 = dma.vmem_to_hbm [thread:$0]  %s271_s21, 16, %s560_s6, [#allocation6]  }
 0x1da   :  { %433 = dma.done.wait [#allocation6], 16  }
 0x1db   :  { %434 = vsyncadd [#allocation6], 4294967280 }
 0x1dc   :  { %277 = vsyncpa [#allocation5], 1 }
 0x1dd   :  { %278 = vsyncpa [#allocation8], 1 }
 0x1de   :  { %279 = vsyncpa [#allocation11], 1 }
 0x1df   :  { %280 = vsyncpa [#allocation6], 1 }

</bundles_post_ra>
